<compile_context>
chip_gen: v7x
topology: tpu7x:2x2x1
jax: 0.10.0
libtpu: 0.0.40
codegen_flags: <defaults>
</compile_context>

<pallas_src>
import numpy as np
import jax
import jax.numpy as jnp
from jax import lax
from jax.experimental import pallas as pl
from jax.experimental.pallas import tpu as pltpu

TM_MAX = 128    # max rows per tile
TN = 128        # lane-dense output tile (Cout padded to a multiple of 128)
TK_MAX = 2048   # reduction-tile cap; K <= TK_MAX collapses the k grid to 1 step


def _round_up(x, m):
    return -(-x // m) * m


def _pad_to(x, m, axis):
    pad = (-x.shape[axis]) % m
    if pad == 0:
        return x
    widths = [(0, 0)] * x.ndim
    widths[axis] = (0, pad)
    return jnp.pad(x, widths)


def _mm_bias_relu_kernel(p_ref, w_ref, b_ref, o_ref, acc_ref):
    """out = relu(patches @ w_folded + bias); accumulates over the k grid axis."""
    @pl.when(pl.program_id(2) == 0)
    def _():
        acc_ref[...] = jnp.zeros_like(acc_ref)

    acc_ref[...] += jnp.dot(p_ref[...], w_ref[...],
                            preferred_element_type=jnp.float32)

    @pl.when(pl.program_id(2) == pl.num_programs(2) - 1)
    def _():
        o_ref[...] = jnp.maximum(acc_ref[...] + b_ref[...], 0.0).astype(o_ref.dtype)


def matmul_bias_relu(patches, w_mat, bias):
    """Pallas tiled matmul (bf16 operands, f32 accum) with fused bias + ReLU.

    Returns an (M, Cp) f32 array, Cp = round_up(Cout, 128).  Padded output
    channels are exactly zero (zero weight columns, zero bias, relu(0) = 0).
    """
    M, K = patches.shape
    Cout = w_mat.shape[1]

    # shape-adaptive tiles: rows sized to the real M, single k step when K fits
    tm = min(TM_MAX, _round_up(M, 8))
    tk = min(TK_MAX, _round_up(K, 128))
    Cp = _round_up(Cout, TN)
    # Give v7x's two TensorCores something to split when the (i, j) grid would
    # otherwise be (1, 1); harmless extra grid step on single-TC chips.
    if _round_up(M, tm) // tm == 1 and Cp // TN == 1 and tm >= 16 and tm % 16 == 0:
        tm //= 2

    p = _pad_to(_pad_to(patches, tm, 0), tk, 1).astype(jnp.bfloat16)
    w = _pad_to(_pad_to(w_mat, tk, 0), TN, 1).astype(jnp.bfloat16)
    b = _pad_to(bias.reshape(1, -1).astype(jnp.float32), TN, 1)

    Mp, Kp = p.shape
    grid = (Mp // tm, Cp // TN, Kp // tk)

    out = pl.pallas_call(
        _mm_bias_relu_kernel,
        out_shape=jax.ShapeDtypeStruct((Mp, Cp), jnp.float32),
        grid_spec=pltpu.PrefetchScalarGridSpec(
            num_scalar_prefetch=0,
            grid=grid,
            in_specs=[
                pl.BlockSpec((tm, tk), lambda i, j, k: (i, k)),   # patches tile
                pl.BlockSpec((tk, TN), lambda i, j, k: (k, j)),   # scale-folded weights
                pl.BlockSpec((1, TN), lambda i, j, k: (0, j)),    # folded BN bias
            ],
            out_specs=pl.BlockSpec((tm, TN), lambda i, j, k: (i, j)),
            scratch_shapes=[pltpu.VMEM((tm, TN), jnp.float32)],
        ),
        compiler_params=pltpu.CompilerParams(
            dimension_semantics=("parallel", "parallel", "arbitrary")),
    )(p, w, b)

    if Mp != M:
        out = out[:M]
    return out


def im2col(x, k, s, p):
    """x: (N, H, W, C) -> patches (N, Ho, Wo, k*k*C); feature order (kh, kw, C)."""
    N, H, W, C = x.shape
    xp = jnp.pad(x, ((0, 0), (p, p), (p, p), (0, 0)))
    Ho = (H + 2 * p - k) // s + 1
    Wo = (W + 2 * p - k) // s + 1
    cols = []
    for dh in range(k):
        for dw in range(k):
            cols.append(xp[:, dh:dh + s * Ho:s, dw:dw + s * Wo:s, :])
    # TODO(synk): for large inputs, read conv windows directly via the K-axis
    # index_map (or fuse all three convs VMEM-resident) instead of
    # materializing k*k-expanded patches in HBM.
    return jnp.concatenate(cols, axis=-1), Ho, Wo


def conv_bn_relu(x_nhwc, w, scale, bias, k, s, p):
    """One ConvBasic block with inference-mode BN folded into weight/bias.

    The incoming activation may carry zero-padded channels; the weight is
    zero-padded along Cin to match (padded channels contribute nothing).  The
    output keeps Cout padded to a multiple of 128 (padded channels stay 0).
    """
    N = x_nhwc.shape[0]
    cin_act = x_nhwc.shape[-1]
    Cout, Cin_w = w.shape[0], w.shape[1]
    if cin_act > Cin_w:
        w = jnp.pad(w, ((0, 0), (0, cin_act - Cin_w), (0, 0), (0, 0)))

    patches, Ho, Wo = im2col(x_nhwc, k, s, p)
    # (Cout, Cin, kh, kw) -> (kh*kw*Cin, Cout), matching the im2col feature
    # order, with the BN scale folded into the weight columns.
    w_mat = jnp.transpose(w, (2, 3, 1, 0)).reshape(k * k * cin_act, Cout)
    w_mat = w_mat * scale[None, :]

    y = matmul_bias_relu(patches.reshape(N * Ho * Wo, k * k * cin_act),
                         w_mat, bias)
    return y.reshape(N, Ho, Wo, y.shape[-1])


def init_intrfe_params(key, chan_in, inter_chans=32, last_conv_chan=128):
    """Deterministic synthetic params. Returns list of (w, scale, bias, k, s, p)."""
    # (Cout, Cin, kernel, stride, pad) — mirrors IntrFE.__init__
    cfgs = [
        (inter_chans, chan_in, 5, 2, 2),         # conv1
        (inter_chans, inter_chans, 3, 2, 1),     # conv2
        (last_conv_chan, inter_chans, 3, 1, 1),  # conv3
    ]
    eps = 1e-5
    params = []
    for cout, cin, k, s, p in cfgs:
        key, kw_, kg, kb, km, kv = jax.random.split(key, 6)
        w = jax.random.normal(kw_, (cout, cin, k, k), jnp.float32) * 0.05
        gamma = 1.0 + 0.1 * jax.random.normal(kg, (cout,), jnp.float32)
        beta = 0.1 * jax.random.normal(kb, (cout,), jnp.float32)
        mean = 0.1 * jax.random.normal(km, (cout,), jnp.float32)
        var = jax.random.uniform(kv, (cout,), jnp.float32, minval=0.5, maxval=1.5)
        # fold inference-mode BatchNorm: y = gamma*(x-mean)/sqrt(var+eps) + beta
        scale = gamma / jnp.sqrt(var + eps)
        bias = beta - mean * scale
        params.append((w, scale, bias, k, s, p))
    return params


def intrfe_forward(x_nchw, params):
    """IntrFE.forward: conv1 -> conv2 -> conv3, each Conv+BN(eval)+ReLU."""
    x = jnp.transpose(x_nchw, (0, 2, 3, 1))          # NCHW -> NHWC
    for (w, scale, bias, k, s, p) in params:
        x = conv_bn_relu(x, w, scale, bias, k, s, p)
    x = x[..., :params[-1][0].shape[0]]               # drop channel padding once
    return jnp.transpose(x, (0, 3, 1, 2))             # NHWC -> NCHW


def ref_forward(x_nchw, params):
    """Pure-JAX reference (lax conv, f32) for verification."""
    x = x_nchw
    for (w, scale, bias, k, s, p) in params:
        y = lax.conv_general_dilated(
            x, w, window_strides=(s, s), padding=[(p, p), (p, p)],
            dimension_numbers=("NCHW", "OIHW", "NCHW"))
        y = y * scale[None, :, None, None] + bias[None, :, None, None]
        x = jnp.maximum(y, 0.0)
    return x


if __name__ == "__main__":
    key = jax.random.PRNGKey(0)
    kx, kp = jax.random.split(key)

    # small shapes: batch=2, chanIn=4, spatial=16; interChans=32, last_conv_chan=128
    x = jax.random.normal(kx, (2, 4, 16, 16), jnp.float32)  # NCHW, like PyTorch
    params = init_intrfe_params(kp, chan_in=4, inter_chans=32, last_conv_chan=128)

    out = intrfe_forward(x, params)
    out = jax.block_until_ready(out)

    assert out.shape == (2, 128, 4, 4), out.shape
    ref = jax.block_until_ready(ref_forward(x, params))
    # tolerance accounts for bf16 matmul operands (f32 accumulation)
    np.testing.assert_allclose(np.asarray(out), np.asarray(ref),
                               atol=3e-2, rtol=2e-2)
    print("KERNEL_OK")
</pallas_src>

<mosaic_0001>
module attributes {stable_mosaic.version = 11 : i64} {
  func.func @_mm_bias_relu_kernel(%arg0: i32, %arg1: i32, %arg2: i32, %arg3: memref<64x128xbf16, #tpu.memory_space<vmem>>, %arg4: memref<128x128xbf16, #tpu.memory_space<vmem>>, %arg5: memref<1x128xf32, #tpu.memory_space<vmem>>, %arg6: memref<64x128xf32, #tpu.memory_space<vmem>>, %arg7: memref<64x128xf32, #tpu.memory_space<vmem>>) attributes {dimension_semantics = [#tpu.dimension_semantics<parallel>, #tpu.dimension_semantics<parallel>, #tpu.dimension_semantics<arbitrary>], iteration_bounds = array<i64: 2, 1, 1>, scalar_prefetch = 0 : i64, scratch_operands = 1 : i64, tpu.core_type = #tpu.core_type<tc>, window_params = [{transform_indices = @transform_0, window_bounds = array<i64: 64, 128>}, {transform_indices = @transform_1, window_bounds = array<i64: 128, 128>}, {transform_indices = @transform_2, window_bounds = array<i64: 1, 128>}, {transform_indices = @transform_3, window_bounds = array<i64: 64, 128>}]} {
    %c0_i32 = arith.constant 0 : i32
    %0 = arith.cmpi eq, %arg2, %c0_i32 : i32
    %1 = arith.extui %0 : i1 to i32
    %c0_i32_0 = arith.constant 0 : i32
    %2 = arith.cmpi ne, %1, %c0_i32_0 : i32
    scf.if %2 {
      %cst_10 = arith.constant 0.000000e+00 : f32
      %12 = vector.broadcast %cst_10 : f32 to vector<64x128xf32>
      %c0_11 = arith.constant 0 : index
      %c0_12 = arith.constant 0 : index
      %13 = vector.load %arg7[%c0_11, %c0_12] : memref<64x128xf32, #tpu.memory_space<vmem>>, vector<64x128xf32>
      tpu.vector_store %arg7[%c0_11, %c0_12], %12 {strides = array<i32>} : memref<64x128xf32, #tpu.memory_space<vmem>>, vector<64x128xf32>,
    } else {
    }
    %c0 = arith.constant 0 : index
    %c0_1 = arith.constant 0 : index
    %3 = vector.load %arg7[%c0, %c0_1] : memref<64x128xf32, #tpu.memory_space<vmem>>, vector<64x128xf32>
    %c0_2 = arith.constant 0 : index
    %c0_3 = arith.constant 0 : index
    %4 = vector.load %arg3[%c0_2, %c0_3] : memref<64x128xbf16, #tpu.memory_space<vmem>>, vector<64x128xbf16>
    %c0_4 = arith.constant 0 : index
    %c0_5 = arith.constant 0 : index
    %5 = vector.load %arg4[%c0_4, %c0_5] : memref<128x128xbf16, #tpu.memory_space<vmem>>, vector<128x128xbf16>
    %cst = arith.constant dense<0.000000e+00> : vector<64x128xf32>
    %6 = tpu.matmul %4, %5, %cst {dimension_numbers = #tpu.dot_dimension_numbers<[1], [0], [0], [1], [0, 0, 1, 1], [], []>} : vector<64x128xbf16>, vector<128x128xbf16>, vector<64x128xf32> -> vector<64x128xf32>
    %7 = arith.addf %3, %6 : vector<64x128xf32>
    %c0_6 = arith.constant 0 : index
    %c0_7 = arith.constant 0 : index
    %8 = vector.load %arg7[%c0_6, %c0_7] : memref<64x128xf32, #tpu.memory_space<vmem>>, vector<64x128xf32>
    tpu.vector_store %arg7[%c0_6, %c0_7], %7 {strides = array<i32>} : memref<64x128xf32, #tpu.memory_space<vmem>>, vector<64x128xf32>,
    %c0_i32_8 = arith.constant 0 : i32
    %9 = arith.cmpi eq, %arg2, %c0_i32_8 : i32
    %10 = arith.extui %9 : i1 to i32
    %c0_i32_9 = arith.constant 0 : i32
    %11 = arith.cmpi ne, %10, %c0_i32_9 : i32
    scf.if %11 {
      %c0_10 = arith.constant 0 : index
      %c0_11 = arith.constant 0 : index
      %12 = vector.load %arg7[%c0_10, %c0_11] : memref<64x128xf32, #tpu.memory_space<vmem>>, vector<64x128xf32>
      %c0_12 = arith.constant 0 : index
      %c0_13 = arith.constant 0 : index
      %13 = vector.load %arg5[%c0_12, %c0_13] : memref<1x128xf32, #tpu.memory_space<vmem>>, vector<1x128xf32>
      %14 = vector.broadcast %13 : vector<1x128xf32> to vector<64x128xf32>
      %15 = arith.addf %12, %14 : vector<64x128xf32>
      %cst_14 = arith.constant 0.000000e+00 : f32
      %16 = vector.broadcast %cst_14 : f32 to vector<64x128xf32>
      %17 = arith.maximumf %15, %16 : vector<64x128xf32>
      %c0_15 = arith.constant 0 : index
      %c0_16 = arith.constant 0 : index
      %18 = vector.load %arg6[%c0_15, %c0_16] : memref<64x128xf32, #tpu.memory_space<vmem>>, vector<64x128xf32>
      tpu.vector_store %arg6[%c0_15, %c0_16], %17 {strides = array<i32>} : memref<64x128xf32, #tpu.memory_space<vmem>>, vector<64x128xf32>,
    } else {
    }
    return
  }
  func.func @transform_0(%arg0: i32, %arg1: i32, %arg2: i32) -> (i32, i32) {
    %c0_i32 = arith.constant 0 : i32
    return %arg0, %arg2 : i32, i32
  }
  func.func @transform_1(%arg0: i32, %arg1: i32, %arg2: i32) -> (i32, i32) {
    %c0_i32 = arith.constant 0 : i32
    return %arg2, %arg1 : i32, i32
  }
  func.func @transform_2(%arg0: i32, %arg1: i32, %arg2: i32) -> (i32, i32) {
    %c0_i32 = arith.constant 0 : i32
    %c0_i32_0 = arith.constant 0 : i32
    return %c0_i32, %arg1 : i32, i32
  }
  func.func @transform_3(%arg0: i32, %arg1: i32, %arg2: i32) -> (i32, i32) {
    %c0_i32 = arith.constant 0 : i32
    return %arg0, %arg1 : i32, i32
  }
}

</mosaic_0001>

<bundles_post_ra>
// kernel: tpu_custom_call.1
= control target key start
LH: loop header
LB: loop body
LE: loop exit
PB: predicated region body
PF: predicated region fallthrough
CT: control target
= control target key end

     0   :  { %8 = vsyncpa [#allocation4], 0  ;;  %s1218_s0 = inlined_call_operand.hbm [shape: bf16[128,128], index: 0, kind: input, shape index: {}]   ;;  %s1219_s1 = inlined_call_operand.hbm [shape: bf16[128,128], index: 1, kind: input, shape index: {}]   ;;  %s1220_s2 = inlined_call_operand.vmem [shape: f32[1,128], index: 2, kind: input, shape index: {}]   ;;  %s1221_s3 = inlined_call_operand.hbm [shape: f32[128,128], index: 3, kind: output, shape index: {}]  }
   0x1   :  { %10 = vsyncpa [#allocation4 + $0x1], 0 }
   0x2   :  { %11 = vsyncpa [#allocation7], 0 }
   0x3   :  { %12 = vsyncpa [#allocation5], 0 }
   0x4   :  { %14 = vsyncpa [#allocation5 + $0x1], 0  ;;  %s972_s12 = smov 0   ;;  %s974_s13 = smov 0  }
   0x5   :  { %s976_s14 = smov 0   ;;  %s978_s15 = smov 0  }
   0x6   :  { %s980_s16 = smov 0   ;;  %s982_s17 = smov 0  }
   0x7 LB: > { %s625_s18 = sadd.s32 4294967295, %s943_s17   ;;  %s626_s19 = sadd.s32 4294967294, %s943_s17   ;;  %s943_s17 = sphi %s982_s17, %s20_s17   ;;  %s939_s16 = sphi %s980_s16, %s1245_s16   ;;  %s935_s15 = sphi %s978_s15, %s1244_s15   ;;  %s931_s14 = sphi %s976_s14, %s1243_s14   ;;  %s927_s13 = sphi %s974_s13, %s1242_s13   ;;  %s923_s12 = sphi %s972_s12, %s1241_s12  }
   0x8   : > { %p61_p0 = scmp.ne.s32.totalorder %s927_s13, %s923_s12  ;;  %p1006_p1 = scmp.eq.s32.totalorder %s625_s18, 0 }
   0x9   : > { %p1010_p2 = scmp.eq.s32.totalorder %s625_s18, 1  ;;  %p147_p3 = scmp.eq.s32.totalorder %s626_s19, 1 }
   0xa   : > { %s1226_s20 = scalar_select %p1006_p1, 1, 0 }
   0xb   : > { %s1227_s21 = scalar_select %p1010_p2, 1, 0 }
   0xc   : > { %p1016_p4 = por %p1006_p1, %p61_p0  ;;  %p627_p5 = scmp.ge.s32.totalorder %s943_s17, 1 }
   0xd   : > { %p1021_p6 = por %p147_p3, %p61_p0  ;;  %p154_p7 = scmp.lt.s32.totalorder %s943_s17, 3 }
   0xe   : > { %s1228_s22 = scalar_select %p1016_p4, 1, 0 }
   0xf   : > { %s1229_s23 = scalar_select %p1021_p6, 1, 0 }
  0x10   : > { %p1026_p8 = pnand %p627_p5, %p154_p7  ;;  %s945_s25 = smov [#allocation6]  }
  0x11   : > { %s170_s26 = sshll.u32 %s945_s25, 4  ;;  %s39_s28 = sadd.s32 1, %s939_s16  ;;  %s171_s26 = int_to_ptr.vmem [resolvable:$true] %s170_s26 }
  0x12   : > { %s1230_s24 = scalar_select %p1026_p8, 1, 0 }
  0x13   : > { %p718_p9 = pneg %p1026_p8  ;;  %s799_s4 = scalar_lea.hbm %s1219_s1, 1024 }
  0x14   : > { %p800_p12 = scmp.ne.s32.totalorder %s1219_s1, %s799_s4  ;;  %p806_p5 = scmp.lt.u32.totalorder %s799_s4, %s1219_s1 }
  0x15   : > { %p1035_p11 = pnand %p718_p9, %p1006_p1 }
  0x17   : > { %p801_p13 = pneg %p1035_p11 }
  0x19   : > { %p802_p0 = pnand %p801_p13, %p800_p12 }
  0x1b   : > { %p803_p3 = pneg %p802_p0 }
  0x1d   : > { %p808_p7 = pnand %p806_p5, %p803_p3 }
  0x1f   : > { %811 = shalt.err (!%p808_p7)
}
  0x20   : > { %s812_s9 = scalar_lea.vmem %s171_s26, 1024  ;;  %p820_p1 = scmp.lt.s32.totalorder %s171_s26, %s171_s26 }
  0x21   : > { %p813_p9 = scmp.ne.s32.totalorder %s171_s26, %s812_s9  ;;  %p821_p4 = scmp.lt.s32.totalorder %s812_s9, %s812_s9 }
  0x23   : > { %p815_p10 = pnand %p813_p9, %p801_p13  ;;  %p822_p8 = por %p821_p4, %p820_p1 }
  0x25   : > { %p816_p6 = pneg %p815_p10 }
  0x27   : > { %p823_p2 = pnand %p822_p8, %p816_p6 }
  0x29   : > { %826 = shalt.err (!%p823_p2)
}
  0x2a   : > { %s946_s10 = smov 64   ;;  %s947_s11 = smov 4  }
  0x2b   : > { %721 = dma.hbm_to_vmem [thread:$0]  (!%p1035_p11), %s1219_s1, 1024, %s171_s26, [#allocation7], %s946_s10, %s946_s10, %s947_s11  }
  0x2c   : > { %p41_p1 = scmp.ge.s32.totalorder %s39_s28, 2  ;;  %s48_s25 = sadd.s32 1, %s931_s14 }
  0x2d   : > { %p55_p2 = scmp.ne.s32.totalorder %s931_s14, %s927_s13  ;;  %p56_p4 = scmp.eq.s32.totalorder %s943_s17, 0 }
  0x2e   : > { %s1247_s28 = smov (%p41_p1, %s39_s28), 0  ;;  %p1233_p8 = scmp.ne.s32.totalorder %s1227_s21, 0 }
  0x2f   : > { %p1065_p6 = por %p56_p4, %p55_p2  ;;  %s43_s30 = ssub.s32 %s939_s16, %s1247_s28 }
  0x30   : > { %p1071_p10 = por %p1233_p8, %p55_p2  ;;  %p731_p12 = scmp.lt.s32.totalorder %s943_s17, 2 }
  0x31   : > { %p46_p11 = scmp.eq.s32.totalorder %s43_s30, 0  ;;  %s190_s26 = sand.u32 1, %s931_s14  }
  0x32   : > { %s631_s4 = sshll.u32 %s190_s26, 5  ;;  %s656_s6 = sshll.u32 %s939_s16, 9 }
  0x33   : > { %s1080_s5 = scalar_select %p46_p11, %s931_s14, %s48_s25  }
  0x34   : > { %s1086_s9 = scalar_lea.hbm %s1218_s0, %s656_s6  ;;  %s194_s21 = scalar_lea.vmem [#allocation3], %s631_s4 }
  0x35   : > { %s202_s18 = sshll.u32 %s194_s21, 4  ;;  %p1092_p13 = pnand %p731_p12, %p1065_p6  ;;  %s1088_s18 = int_to_ptr.vmem [resolvable:$true] %s202_s18 }
  0x36   : > { %s1096_s25 = scalar_lea.sflag [#allocation4], %s190_s26  ;;  %s827_s30 = scalar_lea.hbm %s1086_s9, 512 }
  0x37   : > { %p828_p0 = scmp.ne.s32.totalorder %s1086_s9, %s827_s30  ;;  %p829_p3 = pneg %p1092_p13 }
  0x38   : > { %s832_s29 = scalar_lea.hbm %s1218_s0, 1024  ;;  %p833_p9 = scmp.lt.u32.totalorder %s1086_s9, %s1218_s0 }
  0x39   : > { %p830_p5 = pnand %p829_p3, %p828_p0  ;;  %p834_p1 = scmp.lt.u32.totalorder %s832_s29, %s827_s30 }
  0x3a   : > { %p836_p4 = scmp.lt.u32.totalorder %s827_s30, %s1086_s9 }
  0x3b   : > { %p831_p7 = pneg %p830_p5  ;;  %p835_p2 = por %p834_p1, %p833_p9 }
  0x3d   : > { %p837_p6 = por %p836_p4, %p835_p2 }
  0x3f   : > { %p838_p8 = pnand %p837_p6, %p831_p7 }
  0x41   : > { %841 = shalt.err (!%p838_p8)
}
  0x42   : > { %s842_s26 = scalar_lea.vmem %s1088_s18, 512  ;;  %s948_s21 = smov [#allocation3]  }
  0x43   : > { %p843_p12 = scmp.ne.s32.totalorder %s1088_s18, %s842_s26  ;;  %s847_s4 = sshll.u32 %s948_s21, 4  ;;  %s848_s4 = int_to_ptr.vmem [resolvable:$false] %s847_s4 }
  0x44   : > { %s849_s6 = scalar_lea.vmem %s848_s4, 1024  ;;  %p850_p5 = scmp.lt.s32.totalorder %s1088_s18, %s848_s4 }
  0x45   : > { %p845_p11 = pnand %p843_p12, %p829_p3  ;;  %p851_p9 = scmp.lt.s32.totalorder %s849_s6, %s842_s26 }
  0x47   : > { %p846_p0 = pneg %p845_p11  ;;  %p852_p1 = por %p851_p9, %p850_p5 }
  0x49   : > { %p853_p2 = pnand %p852_p1, %p846_p0 }
  0x4b   : > { %856 = shalt.err (!%p853_p2)
}
  0x4c   : > { %725 = dma.hbm_to_vmem [thread:$0]  (!%p1092_p13), %s1086_s9, 512, %s1088_s18, %s1096_s25, %s946_s10, %s946_s10, %s947_s11  }
  0x4d   : > { %p1236_p3 = scmp.ne.s32.totalorder %s1230_s24, 0 }
  0x4e   : > { %s1130_s30 = sand.u32 (!%p1236_p3), 1, %s927_s13   ;;  %p1237_p7 = scmp.ne.s32.totalorder (!%p1236_p3), %s1228_s22, 0 }
  0x4f   : > { %214 = sbr.rel (%p1236_p3) target bundleno = 357 (0x165), region = 32  ;;  %s635_s29 = sshll.u32 (!%p1236_p3), %s1130_s30, 5 }
  0x50   : > { %s217_s7 = scalar_lea.sflag (!%p1236_p3), [#allocation4], %s1130_s30  ;;  %s1134_s8 = scalar_lea.vmem (!%p1236_p3), [#allocation3], %s635_s29 }
  0x56   : > { %910 = dma.done.wait (%p1237_p7), %s217_s7, 512  }
  0x57   : > { %912 = vsyncadd (%p1237_p7), %s217_s7, 4294966784  ;;  %p1238_p13 = scmp.ne.s32.totalorder %s1226_s20, 0 }
  0x59   : > { %914 = dma.done.wait (%p1238_p13), [#allocation7], 1024  }
  0x5a   : > { %916 = vsyncadd (%p1238_p13), [#allocation7], 4294966272  ;;  %v787_v0 = vld [vmem:[#allocation6] sm:$0xff]   ;;  %v788_v1 = vld [vmem:[#allocation6 + $0x8] sm:$0xff]   ;;  %s637_s20 = sshll.u32 %s1130_s30, 6  ;;  %s657_s9 = sshll.u32 %s935_s15, 10 }
  0x5b   : > { %670 = vmatprep.subr.bf16.mxu0 %v787_v0  ;;  %694 = vmatprep.subr.bf16.mxu1 %v787_v0  ;;  %v789_v2 = vld [vmem:[#allocation6 + $0x10] sm:$0xff]   ;;  %v790_v3 = vld [vmem:[#allocation6 + $0x18] sm:$0xff]   ;;  %v795_v4 = vld [vmem:[%s1134_s8] sm:$0xff]   ;;  %s1152_s10 = scalar_lea.vmem [#allocation8], %s637_s20  ;;  %s1163_s19 = scalar_lea.hbm %s1221_s3, %s657_s9 }
  0x5c   : > { %671 = vmatpush3.bf16.msra.mxu0 %v787_v0  ;;  %702 = vmatpush3.bf16.msra.mxu1 %v787_v0  ;;  %v796_v5 = vld [vmem:[%s1134_s8 + $0x10] sm:$0xff]   ;;  %v791_v6 = vld [vmem:[#allocation6 + $0x20] sm:$0xff]   ;;  %v792_v7 = vld [vmem:[#allocation6 + $0x28] sm:$0xff]   ;;  %s511_s11 = sshll.u32 %s1152_s10, 4  ;;  %s497_s25 = scalar_lea.sflag [#allocation5], %s1130_s30  ;;  %s1156_s11 = int_to_ptr.vmem [resolvable:$true] %s511_s11 }
  0x5d   : > { %672 = vmatprep.subr.bf16.mxu0 %v788_v1  ;;  %695 = vmatprep.subr.bf16.mxu1 %v788_v1  ;;  %v793_v8 = vld [vmem:[#allocation6 + $0x30] sm:$0xff]   ;;  %v794_v9 = vld [vmem:[#allocation6 + $0x38] sm:$0xff]   ;;  %v797_v10 = vld [vmem:[%s1134_s8 + $0x8] sm:$0xff]   ;;  %s857_s26 = scalar_lea.vmem %s1156_s11, 1024  ;;  %s949_s21 = smov [#allocation8]  }
  0x5e   : > { %686 = vmatprep.mubr.bf16.mxu0 %v795_v4  ;;  %690 = vmatprep.mubr.bf16.mxu1 %v796_v5  ;;  %v798_v11 = vld [vmem:[%s1134_s8 + $0x18] sm:$0xff]   ;;  %v650_v12 = vld [vmem:[%s1220_s2] ss:$0 sm:$0xff]  ;;  %p858_p4 = scmp.ne.s32.totalorder %s1156_s11, %s857_s26  ;;  %s861_s4 = sshll.u32 %s949_s21, 4  ;;  %s862_s4 = int_to_ptr.vmem [resolvable:$false] %s861_s4 }
  0x5f   : > { %s863_s6 = scalar_lea.vmem %s862_s4, 2048  ;;  %p864_p12 = scmp.lt.s32.totalorder %s1156_s11, %s862_s4 }
  0x60   : > { %673 = vmatpush3.bf16.msra.mxu0 %v788_v1  ;;  %703 = vmatpush3.bf16.msra.mxu1 %v788_v1  ;;  %p859_p6 = pnand %p858_p4, %p1071_p10  ;;  %p865_p11 = scmp.lt.s32.totalorder %s863_s6, %s857_s26 }
  0x61   : > { %674 = vmatprep.subr.bf16.mxu0 %v789_v2  ;;  %696 = vmatprep.subr.bf16.mxu1 %v789_v2 }
  0x62   : > { %p860_p8 = pneg %p859_p6  ;;  %p866_p0 = por %p865_p11, %p864_p12 }
  0x64   : > { %675 = vmatpush3.bf16.msra.mxu0 %v789_v2  ;;  %704 = vmatpush3.bf16.msra.mxu1 %v789_v2  ;;  %p867_p5 = pnand %p866_p0, %p860_p8 }
  0x65   : > { %676 = vmatprep.subr.bf16.mxu0 %v790_v3  ;;  %697 = vmatprep.subr.bf16.mxu1 %v790_v3 }
  0x68   : > { %677 = vmatpush3.bf16.msra.mxu0 %v790_v3  ;;  %705 = vmatpush3.bf16.msra.mxu1 %v790_v3 }
  0x69   : > { %678 = vmatprep.subr.bf16.mxu0 %v791_v6  ;;  %698 = vmatprep.subr.bf16.mxu1 %v791_v6 }
  0x6c   : > { %679 = vmatpush3.bf16.msra.mxu0 %v791_v6  ;;  %706 = vmatpush3.bf16.msra.mxu1 %v791_v6 }
  0x6d   : > { %680 = vmatprep.subr.bf16.mxu0 %v792_v7  ;;  %699 = vmatprep.subr.bf16.mxu1 %v792_v7 }
  0x70   : > { %681 = vmatpush3.bf16.msra.mxu0 %v792_v7  ;;  %707 = vmatpush3.bf16.msra.mxu1 %v792_v7 }
  0x71   : > { %682 = vmatprep.subr.bf16.mxu0 %v793_v8  ;;  %700 = vmatprep.subr.bf16.mxu1 %v793_v8 }
  0x74   : > { %683 = vmatpush3.bf16.msra.mxu0 %v793_v8  ;;  %708 = vmatpush3.bf16.msra.mxu1 %v793_v8 }
  0x75   : > { %684 = vmatprep.subr.bf16.mxu0 %v794_v9  ;;  %701 = vmatprep.subr.bf16.mxu1 %v794_v9 }
  0x78   : > { %685 = vmatpush3.bf16.msra.mxu0 %v794_v9  ;;  %709 = vmatpush3.bf16.msra.mxu1 %v794_v9 }
  0x7b   : > { %687 = vmatmul.mubr.bf16.vlgmr.msra.gmra.mrb[0].mxu0 %v797_v10  ;;  %691 = vmatmul.mubr.bf16.vlgmr.msra.gmra.mrb[0].mxu1 %v798_v11 }
 0x14e   : > { %v688_v13 = vpop.f32.mrb[0].mxu0  ;;  %v692_v14 = vpop.f32.mrb[0].mxu1 }
 0x14f   : > { %v474_v15 = vadd.f32 %v688_v13, %v650_v12  ;;  %v478_v16 = vadd.f32 %v692_v14, %v650_v12  ;;  %v407_v17 = vpop.f32.mrb[1].mxu0  ;;  %v423_v18 = vpop.f32.mrb[1].mxu1 }
 0x150   : > { %v472_v19 = vadd.f32 %v650_v12, %v407_v17  ;;  %v476_v20 = vadd.f32 %v650_v12, %v423_v18  ;;  %v689_v21 = vpop.f32.mrb[2].mxu0  ;;  %v693_v22 = vpop.f32.mrb[2].mxu1 }
 0x151   : > { %v482_v23 = vmax.f32 %v474_v15, 0.0  ;;  %v486_v24 = vmax.f32 %v478_v16, 0.0  ;;  %v475_v25 = vadd.f32 %v689_v21, %v650_v12  ;;  %v479_v26 = vadd.f32 %v693_v22, %v650_v12  ;;  %v410_v27 = vpop.f32.mrb[3].mxu0  ;;  %v426_v28 = vpop.f32.mrb[3].mxu1 }
 0x152   : > { %v480_v29 = vmax.f32 %v472_v19, 0.0  ;;  %v484_v30 = vmax.f32 %v476_v20, 0.0  ;;  %v473_v31 = vadd.f32 %v650_v12, %v410_v27  ;;  %v477_v32 = vadd.f32 %v650_v12, %v426_v28 }
 0x153   : > { %490 = vst [vmem:[%s1152_s10 + $0x10] sm:$0xff] %v482_v23  ;;  %494 = vst [vmem:[%s1152_s10 + $0x30] sm:$0xff] %v486_v24  ;;  %v483_v33 = vmax.f32 %v475_v25, 0.0  ;;  %v487_v34 = vmax.f32 %v479_v26, 0.0 }
 0x154   : > { %488 = vst [vmem:[%s1152_s10] sm:$0xff] %v480_v29  ;;  %492 = vst [vmem:[%s1152_s10 + $0x20] sm:$0xff] %v484_v30  ;;  %v481_v35 = vmax.f32 %v473_v31, 0.0  ;;  %v485_v36 = vmax.f32 %v477_v32, 0.0 }
 0x155   : > { %491 = vst [vmem:[%s1152_s10 + $0x18] sm:$0xff] %v483_v33  ;;  %495 = vst [vmem:[%s1152_s10 + $0x38] sm:$0xff] %v487_v34 }
 0x156   : > { %489 = vst [vmem:[%s1152_s10 + $0x8] sm:$0xff] %v481_v35  ;;  %493 = vst [vmem:[%s1152_s10 + $0x28] sm:$0xff] %v485_v36 }
 0x157   : > { %870 = shalt.err (!%p867_p5)
}
 0x158   : > { %s871_s29 = scalar_lea.hbm %s1163_s19, 1024  ;;  %s875_s20 = scalar_lea.hbm %s1221_s3, 2048 }
 0x159   : > { %p872_p9 = scmp.ne.s32.totalorder %s1163_s19, %s871_s29  ;;  %p876_p3 = scmp.lt.u32.totalorder %s1163_s19, %s1221_s3 }
 0x15a   : > { %p877_p7 = scmp.lt.u32.totalorder %s875_s20, %s871_s29  ;;  %p879_p4 = scmp.lt.u32.totalorder %s871_s29, %s1163_s19 }
 0x15b   : > { %p873_p1 = pnand %p872_p9, %p1071_p10 }
 0x15c   : > { %p878_p13 = por %p877_p7, %p876_p3 }
 0x15d   : > { %p874_p2 = pneg %p873_p1 }
 0x15e   : > { %p880_p6 = por %p879_p4, %p878_p13 }
 0x160   : > { %p881_p8 = pnand %p880_p6, %p874_p2 }
 0x162   : > { %884 = shalt.err (!%p881_p8)
}
 0x163   : > { %s950_s10 = smov 128   ;;  %s951_s9 = smov 8  }
 0x164   : > { %716 = dma.vmem_to_hbm [thread:$0]  (%p1071_p10), %s1156_s11, 1024, %s1163_s19, %s497_s25, %s950_s10, %s950_s10, %s951_s9  }
 0x165 PF: > { %s526_s15 = sand.u32 1, %s923_s12   ;;  %p1239_p12 = scmp.ne.s32.totalorder %s1229_s23, 0 }
 0x166   : > { %p1240_p11 = scmp.ge.s32.totalorder %s943_s17, 2  ;;  %s527_s18 = scalar_lea.sflag [#allocation5], %s526_s15 }
 0x168   : > { %p727_p0 = pnand %p1240_p11, %p1239_p12 }
 0x16a   : > { %918 = dma.done.wait (!%p727_p0), %s527_s18, 1024  }
 0x16b   : > { %920 = vsyncadd (!%p727_p0), %s527_s18, 4294966272  ;;  %s20_s17 = sadd.s32 1, %s943_s17   ;;  %s1241_s12 = smov %s927_s13 }
 0x16c   : > { %p17_p5 = scmp.ge.s32.totalorder %s20_s17, 4   ;;  %s1242_s13 = smov %s931_s14 }
 0x16d   : > { %s1243_s14 = smov %s1080_s5  ;;  %s1244_s15 = smov %s939_s16 }
 0x16e   : > { %s1245_s16 = smov %s1247_s28  ;;  %19 = sbr.rel (!%p17_p5) target bundleno = 7 (0x7), region = 93 }
 0x175   :  { %532 = vsyncpa [#allocation4], 1 }
 0x176   :  { %534 = vsyncpa [#allocation4 + $0x1], 1 }
 0x177   :  { %535 = vsyncpa [#allocation7], 1 }
 0x178   :  { %536 = vsyncpa [#allocation5], 1 }
 0x179   :  { %538 = vsyncpa [#allocation5 + $0x1], 1 }

</bundles_post_ra>
